<compile_context>
chip_gen: v5e
topology: v5e:2x2
jax: 0.10.0
libtpu: 0.0.40
codegen_flags: <defaults>
</compile_context>

<pallas_src>
import math
from functools import partial

import jax
import jax.numpy as jnp
from jax import lax
from jax.experimental import pallas as pl
from jax.experimental.pallas import tpu as pltpu


# ----------------------------- helpers ---------------------------------------

def _round_up(x, m):
    return ((x + m - 1) // m) * m


def _tpu_generation_defaults():
    """Per-generation (batch tile cap, vmem_limit_bytes, elementwise dtype)."""
    try:
        kind = jax.devices()[0].device_kind.lower()
    except Exception:
        kind = ""
    is_v7 = ("v7" in kind) or ("tpu7" in kind) or ("ironwood" in kind)
    old_gen = any(t in kind for t in ("v2", "v3", "v4", "v5"))
    tile_cap = 2048 if is_v7 else 4096               # v7x has 64 MiB VMEM -> smaller cap
    vmem_limit = (32 if is_v7 else 64) * 1024 * 1024
    ew_dtype = jnp.float32 if old_gen else jnp.bfloat16   # bf16 VPU/EUP only on v6e/v7x
    return tile_cap, vmem_limit, ew_dtype


# ----------------------------- Pallas kernel ---------------------------------

def adaptive_config_kernel(
    x_ref,                       # [TILE_B, adapt_dim]           (f32)
    w1_ref, b1_ref,              # adapt_dim -> 256               (bf16 / f32)
    w2_ref, b2_ref,              # 256 -> 128
    w3_ref, b3_ref,              # 128 -> NL4_PAD (zero-padded cols)
    rw1_ref, rb1_ref,            # NL4_PAD -> 128 (zero-padded rows)
    rw2_ref, rb2_ref,            # 128 -> NL4_PAD (zero-padded cols)
    out_ref,                     # [8, NL4_PAD]  per-tile partial batch-sum (lane-dense)
    *, batch, nl4, tile_b, ew_dtype,
):
    nl4_pad = out_ref.shape[-1]

    # Hoisted lane-validity mask, shared by both softmaxes (JAX doesn't CSE iota).
    lane = lax.broadcasted_iota(jnp.int32, (1, nl4_pad), 1)
    lane_valid = lane < nl4

    def softmax_masked(z):                      # f32 in, f32 out; padded lanes -> 0
        z = jnp.where(lane_valid, z, -jnp.inf)
        m = jnp.max(z, axis=-1, keepdims=True)
        e = jnp.exp(z - m)                      # exp(-inf) == 0 on padded lanes
        denom = jnp.sum(e, axis=-1, keepdims=True)
        return e * pl.reciprocal(denom, approx=True)

    def gelu_ew(h):
        # tanh-approximate GELU (EUP slot); bf16 elementwise on v6e/v7x.
        # TODO(synk): differs from PyTorch nn.GELU() exact-erf by ~1e-3 relative.
        return jax.nn.gelu(h.astype(ew_dtype), approximate=True)

    # ---- config_net: Linear -> GELU -> Linear -> GELU -> Linear ----
    x = x_ref[...].astype(jnp.bfloat16)
    h = jnp.dot(x, w1_ref[...], preferred_element_type=jnp.float32) + b1_ref[...]
    h = gelu_ew(h)
    h = jnp.dot(h.astype(jnp.bfloat16), w2_ref[...],
                preferred_element_type=jnp.float32) + b2_ref[...]
    h = gelu_ew(h)
    cfg = jnp.dot(h.astype(jnp.bfloat16), w3_ref[...],
                  preferred_element_type=jnp.float32) + b3_ref[...]
    cfg = softmax_masked(cfg)                   # rows sum to ~1 over the real nl4 lanes

    # ---- reflection_net: Linear -> GELU -> Linear -> sigmoid ----
    r = jnp.dot(cfg.astype(jnp.bfloat16), rw1_ref[...],
                preferred_element_type=jnp.float32) + rb1_ref[...]
    r = gelu_ew(r)
    r = jnp.dot(r.astype(jnp.bfloat16), rw2_ref[...],
                preferred_element_type=jnp.float32) + rb2_ref[...]
    r = jax.nn.sigmoid(r.astype(ew_dtype)).astype(jnp.float32)

    # adjusted config: product + softmax (padded lanes masked again)
    adj = softmax_masked(cfg * r)

    # Tail-tile row masking, emitted only when a tail exists (static).  Keep it a
    # select: garbage rows of the padded tail block may contain NaN/Inf.
    if batch % tile_b != 0:
        rows_valid = batch - pl.program_id(0) * tile_b
        row_idx = lax.broadcasted_iota(jnp.int32, adj.shape, 0)
        adj = jnp.where(row_idx < rows_valid, adj, 0.0)

    # Per-tile partial batch sum, broadcast to a lane-dense (8, NL4_PAD) block.
    partial = jnp.sum(adj, axis=0, keepdims=True)
    out_ref[...] = jnp.broadcast_to(partial, out_ref.shape)


# ------------------------------- wrapper --------------------------------------

def make_params(adapt_dim: int, num_layers: int, key):
    """Xavier-uniform weights stored [in, out] (bf16, lane-padded) and zero biases."""
    def xavier(k, fan_in, fan_out):
        bound = math.sqrt(6.0 / (fan_in + fan_out))
        return jax.random.uniform(k, (fan_in, fan_out), jnp.float32, -bound, bound)

    nl4 = num_layers * 4
    nl4_pad = _round_up(nl4, 128)
    ks = jax.random.split(key, 5)

    w1 = xavier(ks[0], adapt_dim, 256)
    w2 = xavier(ks[1], 256, 128)
    w3 = xavier(ks[2], 128, nl4)
    rw1 = xavier(ks[3], nl4, 128)
    rw2 = xavier(ks[4], 128, nl4)

    # zero-pad the nl4-sized dims out to 128 lanes (outputs stay exact because
    # the padded lanes are masked in both softmaxes and padded rw1 rows are 0).
    w3p = jnp.zeros((128, nl4_pad), jnp.float32).at[:, :nl4].set(w3)
    rw1p = jnp.zeros((nl4_pad, 128), jnp.float32).at[:nl4, :].set(rw1)
    rw2p = jnp.zeros((128, nl4_pad), jnp.float32).at[:, :nl4].set(rw2)

    return dict(
        w1=w1.astype(jnp.bfloat16),  b1=jnp.zeros((1, 256), jnp.float32),
        w2=w2.astype(jnp.bfloat16),  b2=jnp.zeros((1, 128), jnp.float32),
        w3=w3p.astype(jnp.bfloat16), b3=jnp.zeros((1, nl4_pad), jnp.float32),
        rw1=rw1p.astype(jnp.bfloat16), rb1=jnp.zeros((1, 128), jnp.float32),
        rw2=rw2p.astype(jnp.bfloat16), rb2=jnp.zeros((1, nl4_pad), jnp.float32),
    )


@partial(jax.jit, static_argnames=("num_layers",))
def adaptive_configuration_means(adapt_input, params, num_layers: int):
    """Hot path. Returns [num_layers, 4] batch-means of the adjusted configuration
    as a device array (no host sync here)."""
    batch, adapt_dim = adapt_input.shape
    nl4 = num_layers * 4
    nl4_pad = params["w3"].shape[1]

    tile_cap, vmem_limit, ew_dtype = _tpu_generation_defaults()
    tile_b = min(batch, tile_cap)
    num_tiles = pl.cdiv(batch, tile_b)

    def resident(shape):
        # Constant index_map, fetched once, never re-fetched: single buffer.
        return pl.BlockSpec(shape, lambda b: (0, 0), pipeline_mode=pl.Buffered(1))

    kernel = partial(adaptive_config_kernel,
                     batch=batch, nl4=nl4, tile_b=tile_b, ew_dtype=ew_dtype)

    out = pl.pallas_call(
        kernel,
        # One lane-dense (8, nl4_pad) partial-sum block per grid step.
        out_shape=jax.ShapeDtypeStruct((num_tiles * 8, nl4_pad), jnp.float32),
        grid_spec=pltpu.PrefetchScalarGridSpec(
            num_scalar_prefetch=0,
            grid=(num_tiles,),
            in_specs=[
                pl.BlockSpec((tile_b, adapt_dim), lambda b: (b, 0)),     # x (streamed)
                resident(params["w1"].shape),
                resident(params["b1"].shape),
                resident(params["w2"].shape),
                resident(params["b2"].shape),
                resident(params["w3"].shape),
                resident(params["b3"].shape),
                resident(params["rw1"].shape),
                resident(params["rb1"].shape),
                resident(params["rw2"].shape),
                resident(params["rb2"].shape),
            ],
            out_specs=pl.BlockSpec((8, nl4_pad), lambda b: (b, 0)),
        ),
        compiler_params=pltpu.CompilerParams(
            # No cross-step accumulator -> batch axis is embarrassingly parallel
            # (v7x shards it across its 2 TensorCores).
            dimension_semantics=("parallel",),
            vmem_limit_bytes=vmem_limit,
        ),
    )(
        adapt_input,
        params["w1"], params["b1"],
        params["w2"], params["b2"],
        params["w3"], params["b3"],
        params["rw1"], params["rb1"],
        params["rw2"], params["rb2"],
    )

    # Final reduce over the (tiny) per-tile partial sums.
    partials = out.reshape(num_tiles, 8, nl4_pad)[:, 0, :]     # (num_tiles, nl4_pad)
    mean = jnp.sum(partials, axis=0) * (1.0 / batch)
    return mean[:nl4].reshape(num_layers, 4)


def adaptive_configuration_forward(adapt_input, params, num_layers: int):
    """Convenience / logging path only (mirrors AdaptiveConfiguration.forward's
    Dict[str, float] return). Device->host sync and the Python dict loop live
    here, OFF the hot path."""
    means = adaptive_configuration_means(adapt_input, params, num_layers)
    means = jax.device_get(jax.block_until_ready(means))
    names = ("moe_weight", "token_mixer_weight", "channel_mixer_weight", "attention_weight")
    cfg = {}
    for layer in range(num_layers):
        for c, name in enumerate(names):
            cfg[f"layer_{layer + 1}_{name}"] = float(means[layer, c])
    return cfg


# --------------------------- pure-JAX reference --------------------------------

def _reference_means(adapt_input, params, num_layers):
    """f32, exact-erf GELU reference (PyTorch semantics) using the same bf16
    weight values. Used only for the sanity check in __main__."""
    nl4 = num_layers * 4
    f32 = jnp.float32
    w1 = params["w1"].astype(f32); b1 = params["b1"][0]
    w2 = params["w2"].astype(f32); b2 = params["b2"][0]
    w3 = params["w3"][:, :nl4].astype(f32); b3 = params["b3"][0, :nl4]
    rw1 = params["rw1"][:nl4, :].astype(f32); rb1 = params["rb1"][0]
    rw2 = params["rw2"][:, :nl4].astype(f32); rb2 = params["rb2"][0, :nl4]

    def gelu_exact(x):
        return 0.5 * x * (1.0 + lax.erf(x * 0.7071067811865476))

    h = gelu_exact(adapt_input @ w1 + b1)
    h = gelu_exact(h @ w2 + b2)
    cfg = jax.nn.softmax(h @ w3 + b3, axis=-1)
    r = gelu_exact(cfg @ rw1 + rb1)
    r = jax.nn.sigmoid(r @ rw2 + rb2)
    adj = jax.nn.softmax(cfg * r, axis=-1)
    return adj.mean(axis=0).reshape(num_layers, 4)


# -------------------------------- main ----------------------------------------

if __name__ == "__main__":
    batch = 2
    adapt_dim = 32
    num_layers = 4

    key = jax.random.PRNGKey(0)
    k_in, k_params = jax.random.split(key)

    adapt_input = jax.random.normal(k_in, (batch, adapt_dim), jnp.float32)
    params = make_params(adapt_dim, num_layers, k_params)

    # hot path: device array, block once for the demo
    means = jax.block_until_ready(
        adaptive_configuration_means(adapt_input, params, num_layers))

    # numerics sanity vs. f32 / exact-GELU reference (loose tolerance: bf16 dots,
    # tanh-GELU, approx reciprocal are intentional trades)
    ref = _reference_means(adapt_input, params, num_layers)
    assert bool(jnp.all(jnp.isfinite(means)))
    max_err = float(jnp.max(jnp.abs(means - ref)))
    assert max_err < 2.5e-2, f"kernel vs reference mismatch: {max_err}"

    config_dict = adaptive_configuration_forward(adapt_input, params, num_layers)

    # sanity: correct count, all finite, batch-mean of a softmax sums to ~1
    assert len(config_dict) == num_layers * 4
    assert all(math.isfinite(v) for v in config_dict.values())
    total = float(sum(config_dict.values()))
    assert abs(total - 1.0) < 5e-2, f"softmax mean should sum to ~1, got {total}"

    print("KERNEL_OK")
</pallas_src>

<mosaic_0001>
module attributes {stable_mosaic.version = 11 : i64} {
  func.func @adaptive_config_kernel(%arg0: i32, %arg1: memref<2x32xf32, #tpu.memory_space<vmem>>, %arg2: memref<32x256xbf16, #tpu.memory_space<vmem>>, %arg3: memref<1x256xf32, #tpu.memory_space<vmem>>, %arg4: memref<256x128xbf16, #tpu.memory_space<vmem>>, %arg5: memref<1x128xf32, #tpu.memory_space<vmem>>, %arg6: memref<128x128xbf16, #tpu.memory_space<vmem>>, %arg7: memref<1x128xf32, #tpu.memory_space<vmem>>, %arg8: memref<128x128xbf16, #tpu.memory_space<vmem>>, %arg9: memref<1x128xf32, #tpu.memory_space<vmem>>, %arg10: memref<128x128xbf16, #tpu.memory_space<vmem>>, %arg11: memref<1x128xf32, #tpu.memory_space<vmem>>, %arg12: memref<8x128xf32, #tpu.memory_space<vmem>>) attributes {dimension_semantics = [#tpu.dimension_semantics<parallel>], iteration_bounds = array<i64: 1>, scalar_prefetch = 0 : i64, scratch_operands = 0 : i64, tpu.core_type = #tpu.core_type<tc>, window_params = [{transform_indices = @transform_0, window_bounds = array<i64: 2, 32>}, {pipeline_mode = #tpu.pipeline_mode<synchronous>, transform_indices = @transform_1, window_bounds = array<i64: 32, 256>}, {pipeline_mode = #tpu.pipeline_mode<synchronous>, transform_indices = @transform_2, window_bounds = array<i64: 1, 256>}, {pipeline_mode = #tpu.pipeline_mode<synchronous>, transform_indices = @transform_3, window_bounds = array<i64: 256, 128>}, {pipeline_mode = #tpu.pipeline_mode<synchronous>, transform_indices = @transform_4, window_bounds = array<i64: 1, 128>}, {pipeline_mode = #tpu.pipeline_mode<synchronous>, transform_indices = @transform_5, window_bounds = array<i64: 128, 128>}, {pipeline_mode = #tpu.pipeline_mode<synchronous>, transform_indices = @transform_6, window_bounds = array<i64: 1, 128>}, {pipeline_mode = #tpu.pipeline_mode<synchronous>, transform_indices = @transform_7, window_bounds = array<i64: 128, 128>}, {pipeline_mode = #tpu.pipeline_mode<synchronous>, transform_indices = @transform_8, window_bounds = array<i64: 1, 128>}, {pipeline_mode = #tpu.pipeline_mode<synchronous>, transform_indices = @transform_9, window_bounds = array<i64: 128, 128>}, {pipeline_mode = #tpu.pipeline_mode<synchronous>, transform_indices = @transform_10, window_bounds = array<i64: 1, 128>}, {transform_indices = @transform_11, window_bounds = array<i64: 8, 128>}]} {
    %0 = tpu.iota {dimensions = array<i32: 1>} : vector<1x128xi32>
    %c16_i32 = arith.constant 16 : i32
    %1 = vector.broadcast %c16_i32 : i32 to vector<1x128xi32>
    %2 = arith.cmpi slt, %0, %1 : vector<1x128xi32>
    %c0 = arith.constant 0 : index
    %c0_0 = arith.constant 0 : index
    %3 = vector.load %arg1[%c0, %c0_0] : memref<2x32xf32, #tpu.memory_space<vmem>>, vector<2x32xf32>
    %4 = arith.truncf %3 : vector<2x32xf32> to vector<2x32xbf16>
    %c0_1 = arith.constant 0 : index
    %c0_2 = arith.constant 0 : index
    %5 = vector.load %arg2[%c0_1, %c0_2] : memref<32x256xbf16, #tpu.memory_space<vmem>>, vector<32x256xbf16>
    %cst = arith.constant dense<0.000000e+00> : vector<2x256xf32>
    %6 = tpu.matmul %4, %5, %cst {dimension_numbers = #tpu.dot_dimension_numbers<[1], [0], [0], [1], [0, 0, 1, 1], [], []>} : vector<2x32xbf16>, vector<32x256xbf16>, vector<2x256xf32> -> vector<2x256xf32>
    %c0_3 = arith.constant 0 : index
    %c0_4 = arith.constant 0 : index
    %7 = vector.load %arg3[%c0_3, %c0_4] : memref<1x256xf32, #tpu.memory_space<vmem>>, vector<1x256xf32>
    %8 = vector.broadcast %7 : vector<1x256xf32> to vector<2x256xf32>
    %9 = arith.addf %6, %8 : vector<2x256xf32>
    %10 = arith.truncf %9 : vector<2x256xf32> to vector<2x256xbf16>
    %11 = arith.mulf %10, %10 : vector<2x256xbf16>
    %12 = arith.mulf %10, %11 : vector<2x256xbf16>
    %cst_5 = arith.constant 4.467770e-02 : bf16
    %13 = vector.broadcast %cst_5 : bf16 to vector<2x256xbf16>
    %14 = arith.mulf %13, %12 : vector<2x256xbf16>
    %15 = arith.addf %10, %14 : vector<2x256xbf16>
    %cst_6 = arith.constant 7.968750e-01 : bf16
    %16 = vector.broadcast %cst_6 : bf16 to vector<2x256xbf16>
    %17 = arith.mulf %16, %15 : vector<2x256xbf16>
    %18 = math.tanh %17 : vector<2x256xbf16>
    %cst_7 = arith.constant 1.000000e+00 : bf16
    %19 = vector.broadcast %cst_7 : bf16 to vector<2x256xbf16>
    %20 = arith.addf %19, %18 : vector<2x256xbf16>
    %cst_8 = arith.constant 5.000000e-01 : bf16
    %21 = vector.broadcast %cst_8 : bf16 to vector<2x256xbf16>
    %22 = arith.mulf %21, %20 : vector<2x256xbf16>
    %23 = arith.mulf %10, %22 : vector<2x256xbf16>
    %c0_9 = arith.constant 0 : index
    %c0_10 = arith.constant 0 : index
    %24 = vector.load %arg4[%c0_9, %c0_10] : memref<256x128xbf16, #tpu.memory_space<vmem>>, vector<256x128xbf16>
    %cst_11 = arith.constant dense<0.000000e+00> : vector<2x128xf32>
    %25 = tpu.matmul %23, %24, %cst_11 {dimension_numbers = #tpu.dot_dimension_numbers<[1], [0], [0], [1], [0, 0, 1, 1], [], []>} : vector<2x256xbf16>, vector<256x128xbf16>, vector<2x128xf32> -> vector<2x128xf32>
    %c0_12 = arith.constant 0 : index
    %c0_13 = arith.constant 0 : index
    %26 = vector.load %arg5[%c0_12, %c0_13] : memref<1x128xf32, #tpu.memory_space<vmem>>, vector<1x128xf32>
    %27 = vector.broadcast %26 : vector<1x128xf32> to vector<2x128xf32>
    %28 = arith.addf %25, %27 : vector<2x128xf32>
    %29 = arith.truncf %28 : vector<2x128xf32> to vector<2x128xbf16>
    %30 = arith.mulf %29, %29 : vector<2x128xbf16>
    %31 = arith.mulf %29, %30 : vector<2x128xbf16>
    %cst_14 = arith.constant 4.467770e-02 : bf16
    %32 = vector.broadcast %cst_14 : bf16 to vector<2x128xbf16>
    %33 = arith.mulf %32, %31 : vector<2x128xbf16>
    %34 = arith.addf %29, %33 : vector<2x128xbf16>
    %cst_15 = arith.constant 7.968750e-01 : bf16
    %35 = vector.broadcast %cst_15 : bf16 to vector<2x128xbf16>
    %36 = arith.mulf %35, %34 : vector<2x128xbf16>
    %37 = math.tanh %36 : vector<2x128xbf16>
    %cst_16 = arith.constant 1.000000e+00 : bf16
    %38 = vector.broadcast %cst_16 : bf16 to vector<2x128xbf16>
    %39 = arith.addf %38, %37 : vector<2x128xbf16>
    %cst_17 = arith.constant 5.000000e-01 : bf16
    %40 = vector.broadcast %cst_17 : bf16 to vector<2x128xbf16>
    %41 = arith.mulf %40, %39 : vector<2x128xbf16>
    %42 = arith.mulf %29, %41 : vector<2x128xbf16>
    %c0_18 = arith.constant 0 : index
    %c0_19 = arith.constant 0 : index
    %43 = vector.load %arg6[%c0_18, %c0_19] : memref<128x128xbf16, #tpu.memory_space<vmem>>, vector<128x128xbf16>
    %cst_20 = arith.constant dense<0.000000e+00> : vector<2x128xf32>
    %44 = tpu.matmul %42, %43, %cst_20 {dimension_numbers = #tpu.dot_dimension_numbers<[1], [0], [0], [1], [0, 0, 1, 1], [], []>} : vector<2x128xbf16>, vector<128x128xbf16>, vector<2x128xf32> -> vector<2x128xf32>
    %c0_21 = arith.constant 0 : index
    %c0_22 = arith.constant 0 : index
    %45 = vector.load %arg7[%c0_21, %c0_22] : memref<1x128xf32, #tpu.memory_space<vmem>>, vector<1x128xf32>
    %46 = vector.broadcast %45 : vector<1x128xf32> to vector<2x128xf32>
    %47 = arith.addf %44, %46 : vector<2x128xf32>
    %cst_23 = arith.constant 0xFF800000 : f32
    %48 = vector.shape_cast %2 : vector<1x128xi1> to vector<1x128xi1>
    %49 = vector.broadcast %48 : vector<1x128xi1> to vector<2x128xi1>
    %50 = vector.broadcast %cst_23 : f32 to vector<2x128xf32>
    %51 = arith.select %49, %47, %50 : vector<2x128xi1>, vector<2x128xf32>
    %cst_24 = arith.constant dense<0xFF800000> : vector<2xf32>
    %52 = vector.multi_reduction <maximumf>, %51, %cst_24 [1] : vector<2x128xf32> to vector<2xf32>
    %53 = vector.shape_cast %52 : vector<2xf32> to vector<2x1xf32>
    %54 = vector.broadcast %53 : vector<2x1xf32> to vector<2x128xf32>
    %55 = arith.subf %51, %54 : vector<2x128xf32>
    %56 = math.exp %55 : vector<2x128xf32>
    %cst_25 = arith.constant dense<0.000000e+00> : vector<2xf32>
    %57 = vector.multi_reduction <add>, %56, %cst_25 [1] : vector<2x128xf32> to vector<2xf32>
    %58 = vector.shape_cast %57 : vector<2xf32> to vector<2x1xf32>
    %59 = tpu.reciprocal %58 {approx = true} : vector<2x1xf32> -> vector<2x1xf32>
    %60 = vector.broadcast %59 : vector<2x1xf32> to vector<2x128xf32>
    %61 = arith.mulf %56, %60 : vector<2x128xf32>
    %62 = arith.truncf %61 : vector<2x128xf32> to vector<2x128xbf16>
    %c0_26 = arith.constant 0 : index
    %c0_27 = arith.constant 0 : index
    %63 = vector.load %arg8[%c0_26, %c0_27] : memref<128x128xbf16, #tpu.memory_space<vmem>>, vector<128x128xbf16>
    %cst_28 = arith.constant dense<0.000000e+00> : vector<2x128xf32>
    %64 = tpu.matmul %62, %63, %cst_28 {dimension_numbers = #tpu.dot_dimension_numbers<[1], [0], [0], [1], [0, 0, 1, 1], [], []>} : vector<2x128xbf16>, vector<128x128xbf16>, vector<2x128xf32> -> vector<2x128xf32>
    %c0_29 = arith.constant 0 : index
    %c0_30 = arith.constant 0 : index
    %65 = vector.load %arg9[%c0_29, %c0_30] : memref<1x128xf32, #tpu.memory_space<vmem>>, vector<1x128xf32>
    %66 = vector.broadcast %65 : vector<1x128xf32> to vector<2x128xf32>
    %67 = arith.addf %64, %66 : vector<2x128xf32>
    %68 = arith.truncf %67 : vector<2x128xf32> to vector<2x128xbf16>
    %69 = arith.mulf %68, %68 : vector<2x128xbf16>
    %70 = arith.mulf %68, %69 : vector<2x128xbf16>
    %cst_31 = arith.constant 4.467770e-02 : bf16
    %71 = vector.broadcast %cst_31 : bf16 to vector<2x128xbf16>
    %72 = arith.mulf %71, %70 : vector<2x128xbf16>
    %73 = arith.addf %68, %72 : vector<2x128xbf16>
    %cst_32 = arith.constant 7.968750e-01 : bf16
    %74 = vector.broadcast %cst_32 : bf16 to vector<2x128xbf16>
    %75 = arith.mulf %74, %73 : vector<2x128xbf16>
    %76 = math.tanh %75 : vector<2x128xbf16>
    %cst_33 = arith.constant 1.000000e+00 : bf16
    %77 = vector.broadcast %cst_33 : bf16 to vector<2x128xbf16>
    %78 = arith.addf %77, %76 : vector<2x128xbf16>
    %cst_34 = arith.constant 5.000000e-01 : bf16
    %79 = vector.broadcast %cst_34 : bf16 to vector<2x128xbf16>
    %80 = arith.mulf %79, %78 : vector<2x128xbf16>
    %81 = arith.mulf %68, %80 : vector<2x128xbf16>
    %c0_35 = arith.constant 0 : index
    %c0_36 = arith.constant 0 : index
    %82 = vector.load %arg10[%c0_35, %c0_36] : memref<128x128xbf16, #tpu.memory_space<vmem>>, vector<128x128xbf16>
    %cst_37 = arith.constant dense<0.000000e+00> : vector<2x128xf32>
    %83 = tpu.matmul %81, %82, %cst_37 {dimension_numbers = #tpu.dot_dimension_numbers<[1], [0], [0], [1], [0, 0, 1, 1], [], []>} : vector<2x128xbf16>, vector<128x128xbf16>, vector<2x128xf32> -> vector<2x128xf32>
    %c0_38 = arith.constant 0 : index
    %c0_39 = arith.constant 0 : index
    %84 = vector.load %arg11[%c0_38, %c0_39] : memref<1x128xf32, #tpu.memory_space<vmem>>, vector<1x128xf32>
    %85 = vector.broadcast %84 : vector<1x128xf32> to vector<2x128xf32>
    %86 = arith.addf %83, %85 : vector<2x128xf32>
    %87 = arith.truncf %86 : vector<2x128xf32> to vector<2x128xbf16>
    %88 = arith.negf %87 : vector<2x128xbf16>
    %89 = math.exp %88 : vector<2x128xbf16>
    %cst_40 = arith.constant 1.000000e+00 : bf16
    %90 = vector.broadcast %cst_40 : bf16 to vector<2x128xbf16>
    %91 = arith.addf %90, %89 : vector<2x128xbf16>
    %92 = arith.divf %90, %91 : vector<2x128xbf16>
    %93 = arith.extf %92 : vector<2x128xbf16> to vector<2x128xf32>
    %94 = arith.mulf %61, %93 : vector<2x128xf32>
    %cst_41 = arith.constant 0xFF800000 : f32
    %95 = vector.shape_cast %2 : vector<1x128xi1> to vector<1x128xi1>
    %96 = vector.broadcast %95 : vector<1x128xi1> to vector<2x128xi1>
    %97 = vector.broadcast %cst_41 : f32 to vector<2x128xf32>
    %98 = arith.select %96, %94, %97 : vector<2x128xi1>, vector<2x128xf32>
    %cst_42 = arith.constant dense<0xFF800000> : vector<2xf32>
    %99 = vector.multi_reduction <maximumf>, %98, %cst_42 [1] : vector<2x128xf32> to vector<2xf32>
    %100 = vector.shape_cast %99 : vector<2xf32> to vector<2x1xf32>
    %101 = vector.broadcast %100 : vector<2x1xf32> to vector<2x128xf32>
    %102 = arith.subf %98, %101 : vector<2x128xf32>
    %103 = math.exp %102 : vector<2x128xf32>
    %cst_43 = arith.constant dense<0.000000e+00> : vector<2xf32>
    %104 = vector.multi_reduction <add>, %103, %cst_43 [1] : vector<2x128xf32> to vector<2xf32>
    %105 = vector.shape_cast %104 : vector<2xf32> to vector<2x1xf32>
    %106 = tpu.reciprocal %105 {approx = true} : vector<2x1xf32> -> vector<2x1xf32>
    %107 = vector.broadcast %106 : vector<2x1xf32> to vector<2x128xf32>
    %108 = arith.mulf %103, %107 : vector<2x128xf32>
    %cst_44 = arith.constant dense<0.000000e+00> : vector<128xf32>
    %109 = vector.multi_reduction <add>, %108, %cst_44 [0] : vector<2x128xf32> to vector<128xf32>
    %110 = vector.shape_cast %109 : vector<128xf32> to vector<1x128xf32>
    %111 = vector.shape_cast %110 : vector<1x128xf32> to vector<1x128xf32>
    %112 = vector.broadcast %111 : vector<1x128xf32> to vector<8x128xf32>
    %c0_45 = arith.constant 0 : index
    %c0_46 = arith.constant 0 : index
    %113 = vector.load %arg12[%c0_45, %c0_46] : memref<8x128xf32, #tpu.memory_space<vmem>>, vector<8x128xf32>
    tpu.vector_store %arg12[%c0_45, %c0_46], %112 {strides = array<i32>} : memref<8x128xf32, #tpu.memory_space<vmem>>, vector<8x128xf32>,
    return
  }
  func.func @transform_0(%arg0: i32) -> (i32, i32) {
    %c0_i32 = arith.constant 0 : i32
    %c0_i32_0 = arith.constant 0 : i32
    return %arg0, %c0_i32 : i32, i32
  }
  func.func @transform_1(%arg0: i32) -> (i32, i32) {
    %c0_i32 = arith.constant 0 : i32
    %c0_i32_0 = arith.constant 0 : i32
    %c0_i32_1 = arith.constant 0 : i32
    return %c0_i32, %c0_i32_0 : i32, i32
  }
  func.func @transform_2(%arg0: i32) -> (i32, i32) {
    %c0_i32 = arith.constant 0 : i32
    %c0_i32_0 = arith.constant 0 : i32
    %c0_i32_1 = arith.constant 0 : i32
    return %c0_i32, %c0_i32_0 : i32, i32
  }
  func.func @transform_3(%arg0: i32) -> (i32, i32) {
    %c0_i32 = arith.constant 0 : i32
    %c0_i32_0 = arith.constant 0 : i32
    %c0_i32_1 = arith.constant 0 : i32
    return %c0_i32, %c0_i32_0 : i32, i32
  }
  func.func @transform_4(%arg0: i32) -> (i32, i32) {
    %c0_i32 = arith.constant 0 : i32
    %c0_i32_0 = arith.constant 0 : i32
    %c0_i32_1 = arith.constant 0 : i32
    return %c0_i32, %c0_i32_0 : i32, i32
  }
  func.func @transform_5(%arg0: i32) -> (i32, i32) {
    %c0_i32 = arith.constant 0 : i32
    %c0_i32_0 = arith.constant 0 : i32
    %c0_i32_1 = arith.constant 0 : i32
    return %c0_i32, %c0_i32_0 : i32, i32
  }
  func.func @transform_6(%arg0: i32) -> (i32, i32) {
    %c0_i32 = arith.constant 0 : i32
    %c0_i32_0 = arith.constant 0 : i32
    %c0_i32_1 = arith.constant 0 : i32
    return %c0_i32, %c0_i32_0 : i32, i32
  }
  func.func @transform_7(%arg0: i32) -> (i32, i32) {
    %c0_i32 = arith.constant 0 : i32
    %c0_i32_0 = arith.constant 0 : i32
    %c0_i32_1 = arith.constant 0 : i32
    return %c0_i32, %c0_i32_0 : i32, i32
  }
  func.func @transform_8(%arg0: i32) -> (i32, i32) {
    %c0_i32 = arith.constant 0 : i32
    %c0_i32_0 = arith.constant 0 : i32
    %c0_i32_1 = arith.constant 0 : i32
    return %c0_i32, %c0_i32_0 : i32, i32
  }
  func.func @transform_9(%arg0: i32) -> (i32, i32) {
    %c0_i32 = arith.constant 0 : i32
    %c0_i32_0 = arith.constant 0 : i32
    %c0_i32_1 = arith.constant 0 : i32
    return %c0_i32, %c0_i32_0 : i32, i32
  }
  func.func @transform_10(%arg0: i32) -> (i32, i32) {
    %c0_i32 = arith.constant 0 : i32
    %c0_i32_0 = arith.constant 0 : i32
    %c0_i32_1 = arith.constant 0 : i32
    return %c0_i32, %c0_i32_0 : i32, i32
  }
  func.func @transform_11(%arg0: i32) -> (i32, i32) {
    %c0_i32 = arith.constant 0 : i32
    %c0_i32_0 = arith.constant 0 : i32
    return %arg0, %c0_i32 : i32, i32
  }
}

</mosaic_0001>

<bundles_post_ra>
// kernel: adaptive_configuration_means.1
= control target key start
LH: loop header
LB: loop body
LE: loop exit
PB: predicated region body
PF: predicated region fallthrough
CT: control target
= control target key end

     0   :  { %16 = vsyncpa [#allocation3], 0  ;;  %s1365_s0 = inlined_call_operand.hbm [shape: f32[2,32], index: 0, kind: input, shape index: {}]   ;;  %s1366_s1 = inlined_call_operand.hbm [shape: bf16[32,256], index: 1, kind: input, shape index: {}]   ;;  %s1367_s2 = inlined_call_operand.hbm [shape: f32[1,256], index: 2, kind: input, shape index: {}]   ;;  %s1368_s3 = inlined_call_operand.hbm [shape: bf16[256,128], index: 3, kind: input, shape index: {}]   ;;  %s1369_s4 = inlined_call_operand.vmem [shape: f32[1,128], index: 4, kind: input, shape index: {}]   ;;  %s1370_s5 = inlined_call_operand.hbm [shape: bf16[128,128], index: 5, kind: input, shape index: {}]   ;;  %s1371_s6 = inlined_call_operand.vmem [shape: f32[1,128], index: 6, kind: input, shape index: {}]   ;;  %s1372_s7 = inlined_call_operand.hbm [shape: bf16[128,128], index: 7, kind: input, shape index: {}]   ;;  %s1373_s8 = inlined_call_operand.vmem [shape: f32[1,128], index: 8, kind: input, shape index: {}]   ;;  %s1374_s9 = inlined_call_operand.hbm [shape: bf16[128,128], index: 9, kind: input, shape index: {}]   ;;  %s1375_s10 = inlined_call_operand.vmem [shape: f32[1,128], index: 10, kind: input, shape index: {}]   ;;  %s1376_s11 = inlined_call_operand.vmem [shape: f32[8,128], index: 11, kind: output, shape index: {}]  }
   0x1   :  { %17 = vsyncpa [#allocation5], 0 }
   0x2   :  { %18 = vsyncpa [#allocation8], 0  ;;  %s35_s19 = sshll.u32 %s1366_s1, 4  ;;  %s36_s19 = int_to_ptr.hbm [resolvable:$true] %s35_s19 }
   0x3   :  { %19 = vsyncpa [#allocation11], 0  ;;  %s1214_s20 = smov [#allocation4]   ;;  %s59_s24 = sshll.u32 %s1368_s3, 4  ;;  %s60_s24 = int_to_ptr.hbm [resolvable:$true] %s59_s24 }
   0x4   :  { %s37_s21 = sshll.u32 %s1214_s20, 4  ;;  %s1215_s25 = smov 128   ;;  %s38_s21 = int_to_ptr.vmem [resolvable:$true] %s37_s21 }
   0x5   :  { %s1216_s26 = smov 8   ;;  %s1217_s27 = smov [#allocation7]  }
   0x6   :  { %43 = dma.hbm_to_vmem [thread:$0]  %s36_s19, 512, %s38_s21, [#allocation5], %s1215_s25, %s1215_s25, %s1216_s26  }
   0x7   :  { %s61_s28 = sshll.u32 %s1217_s27, 4  ;;  %s1218_s29 = smov 64   ;;  %s62_s28 = int_to_ptr.vmem [resolvable:$true] %s61_s28 }
   0x8   :  { %s1219_s30 = smov 4   ;;  %s89_s13 = sshll.u32 %s1372_s7, 4  ;;  %s90_s13 = int_to_ptr.hbm [resolvable:$true] %s89_s13 }
   0x9   :  { %67 = dma.hbm_to_vmem [thread:$0]  %s60_s24, 2048, %s62_s28, [#allocation8], %s1218_s29, %s1218_s29, %s1219_s30  }
   0xa   :  { %s1220_s14 = smov [#allocation10]   ;;  %s25_s17 = sshll.u32 %s1365_s0, 4  ;;  %s26_s17 = int_to_ptr.hbm [resolvable:$true] %s25_s17 }
   0xb   :  { %s91_s3 = sshll.u32 %s1220_s14, 4  ;;  %s1221_s18 = smov [#allocation2]   ;;  %s92_s3 = int_to_ptr.vmem [resolvable:$true] %s91_s3 }
   0xc   :  { %97 = dma.hbm_to_vmem [thread:$0]  %s90_s13, 1024, %s92_s3, [#allocation11], %s1218_s29, %s1218_s29, %s1219_s30  }
   0xd   :  { %s27_s19 = sshll.u32 %s1221_s18, 4  ;;  %s49_s22 = sshll.u32 %s1367_s2, 4  ;;  %s28_s19 = int_to_ptr.vmem [resolvable:$true] %s27_s19  ;;  %s50_s22 = int_to_ptr.hbm [resolvable:$true] %s49_s22 }
   0xe   :  { %30 = dma.hbm_to_vmem [thread:$0]  %s26_s17, 32, %s28_s19, [#allocation3]  }
   0xf   :  { %s74_s24 = sshll.u32 %s1370_s5, 4  ;;  %s1222_s25 = smov [#allocation6]   ;;  %s75_s24 = int_to_ptr.hbm [resolvable:$true] %s74_s24 }
  0x10   :  { %s51_s0 = sshll.u32 %s1222_s25, 4  ;;  %s1223_s26 = smov [#allocation9]   ;;  %s52_s0 = int_to_ptr.vmem [resolvable:$true] %s51_s0 }
  0x11   :  { %54 = dma.hbm_to_vmem [thread:$0]  %s50_s22, 32, %s52_s0, [#allocation5]  }
  0x12   :  { %s76_s27 = sshll.u32 %s1223_s26, 4  ;;  %s104_s12 = sshll.u32 %s1374_s9, 4  ;;  %s77_s27 = int_to_ptr.vmem [resolvable:$true] %s76_s27  ;;  %s105_s12 = int_to_ptr.hbm [resolvable:$true] %s104_s12 }
  0x13   :  { %82 = dma.hbm_to_vmem [thread:$0]  %s75_s24, 1024, %s77_s27, [#allocation8], %s1218_s29, %s1218_s29, %s1219_s30  }
  0x14   :  { %s1224_s2 = smov [#allocation12]  }
  0x15   :  { %s106_s13 = sshll.u32 %s1224_s2, 4  ;;  %s107_s13 = int_to_ptr.vmem [resolvable:$true] %s106_s13 }
  0x16   :  { %112 = dma.hbm_to_vmem [thread:$0]  %s105_s12, 1024, %s107_s13, [#allocation11], %s1218_s29, %s1218_s29, %s1219_s30  }
  0x17   :  { %1206 = dma.done.wait [#allocation3], 32  }
  0x18   :  { %1207 = vsyncadd [#allocation3], 4294967264 }
  0x19   :  { %1208 = dma.done.wait [#allocation5], 544  }
  0x1a   :  { %1209 = vsyncadd [#allocation5], 4294966752 }
  0x1b   :  { %1210 = dma.done.wait [#allocation8], 3072  }
  0x1c   :  { %1211 = vsyncadd [#allocation8], 4294964224 }
  0x1d   :  { %1212 = dma.done.wait [#allocation11], 2048  }
  0x1e   :  { %1213 = vsyncadd [#allocation11], 4294965248  ;;  %v788_v0 = vld [vmem:[#allocation4 + $0x10] sm:$0xf]  ;;  %v959_v1 = vld [vmem:[#allocation4 + $0x14] sm:$0xf0] }
  0x1f   :  { %v958_v2 = vld [vmem:[#allocation4 + $0x14] sm:$0xf]  ;;  %v789_v3 = vor.u32 %v959_v1, %v788_v0  ;;  %v790_v4 = vld [vmem:[#allocation4 + $0x18] sm:$0xf0]  ;;  %v780_v5 = vld [vmem:[#allocation4] sm:$0xf] }
  0x20   :  { %v957_v6 = vld [vmem:[#allocation4 + $0x4] sm:$0xf0]  ;;  %v793_v7 = vor.u32 %v958_v2, %v790_v4  ;;  %v956_v8 = vld [vmem:[#allocation4 + $0x4] sm:$0xf]  ;;  %v782_v9 = vld [vmem:[#allocation4 + $0x8] sm:$0xf0] }
  0x21   :  { %190 = vmatpush.bf16.msra.mxu0 %v789_v3  ;;  %v781_v10 = vor.u32 %v957_v6, %v780_v5  ;;  %v148_v11 = vld [vmem:[#allocation2] sm:$0x3]  ;;  %v785_v12 = vor.u32 %v956_v8, %v782_v9  ;;  %vm180_vm0 = vcmask 261120   ;;  %v154_v14 = vld [vmem:[#allocation6] sm:$0x3]  ;;  %v966_v24 = vld [vmem:[#allocation7 + $0x30] sm:$0xff] }
  0x22   :  { %203 = vmatpush.bf16.msra.mxu1 %v793_v7  ;;  %v149_v13 = vpack.c.bf16 %v148_v11, %v148_v11  ;;  %v156_v15 = vperm.slane %v154_v14, 0  ;;  %v157_v16 = vperm.slane %v154_v14, 1  ;;  %v967_v20 = vld [vmem:[#allocation7 + $0x38] sm:$0xff]  ;;  %v974_v25 = vld [vmem:[#allocation7 + $0x70] sm:$0xff]  ;;  %v965_v28 = vld [vmem:[#allocation7 + $0x28] sm:$0xff]  ;;  %vm527_vm2 = vcmask 1041408  }
  0x23   :  { %v975_v21 = vld [vmem:[#allocation7 + $0x78] sm:$0xff]  ;;  %389 = vmatpush.bf16.msra.mxu2 %v967_v20  ;;  %v973_v29 = vld [vmem:[#allocation7 + $0x68] sm:$0xff]  ;;  %v964_v35 = vld [vmem:[#allocation7 + $0x20] sm:$0xff] }
  0x24   :  { %402 = vmatpush.bf16.msra.mxu3 %v975_v21  ;;  %v972_v36 = vld [vmem:[#allocation7 + $0x60] sm:$0xff]  ;;  %v963_v41 = vld [vmem:[#allocation7 + $0x18] sm:$0xff]  ;;  %v962_v46 = vld [vmem:[#allocation7 + $0x10] sm:$0xff] }
  0x25   :  { %191 = vmatpush.bf16.msra.mxu0 %v781_v10  ;;  %v971_v42 = vld [vmem:[#allocation7 + $0x58] sm:$0xff]  ;;  %v970_v47 = vld [vmem:[#allocation7 + $0x50] sm:$0xff]  ;;  %v961_v51 = vld [vmem:[#allocation7 + $0x8] sm:$0xff] }
  0x26   :  { %204 = vmatpush.bf16.msra.mxu1 %v785_v12  ;;  %v969_v52 = vld [vmem:[#allocation7 + $0x48] sm:$0xff]  ;;  %v960_v57 = vld [vmem:[#allocation7] sm:$0xff] }
  0x27   :  { %390 = vmatpush.bf16.msra.mxu2 %v966_v24  ;;  %v968_v58 = vld [vmem:[#allocation7 + $0x40] sm:$0xff] }
  0x28   :  { %794 = vmatmul.msk.bf16.vlgmr.msra.gmra.mxu0 %vm180_vm0, %v149_v13  ;;  %403 = vmatpush.bf16.msra.mxu3 %v974_v25 }
  0x29   :  { %795 = vmatmul.msk.bf16.vlgmr.msra.gmra.mxu1 %vm180_vm0, %v149_v13 }
  0x2b   :  { %391 = vmatpush.bf16.msra.mxu2 %v965_v28  ;;  %v983_v28 = vld [vmem:[#allocation9 + $0x38] sm:$0xff] }
  0x2c   :  { %404 = vmatpush.bf16.msra.mxu3 %v973_v29  ;;  %511 = vmatpush.bf16.msrb.mxu0 %v983_v28  ;;  %v1014_v28 = vld [vmem:[%s1373_s8] ss:$0 sm:$0xff] }
  0x2f   :  { %392 = vmatpush.bf16.msra.mxu2 %v964_v35 }
  0x30   :  { %405 = vmatpush.bf16.msra.mxu3 %v972_v36  ;;  %v980_v36 = vld [vmem:[#allocation9 + $0x20] sm:$0xff] }
  0x33   :  { %393 = vmatpush.bf16.msra.mxu2 %v963_v41 }
  0x34   :  { %406 = vmatpush.bf16.msra.mxu3 %v971_v42  ;;  %v978_v42 = vld [vmem:[#allocation9 + $0x10] sm:$0xff] }
  0x37   :  { %394 = vmatpush.bf16.msra.mxu2 %v962_v46 }
  0x38   :  { %407 = vmatpush.bf16.msra.mxu3 %v970_v47 }
  0x3b   :  { %395 = vmatpush.bf16.msra.mxu2 %v961_v51 }
  0x3c   :  { %408 = vmatpush.bf16.msra.mxu3 %v969_v52 }
  0x3f   :  { %396 = vmatpush.bf16.msra.mxu2 %v960_v57 }
  0x40   :  { %409 = vmatpush.bf16.msra.mxu3 %v968_v58 }
  0xa5   :  { %v193_v17 = vpop.f32.mrf.mxu0 }
  0xa6   :  { %v194_v18 = vadd.f32 %v193_v17, %v156_v15  ;;  %v206_v19 = vpop.f32.mrf.mxu1 }
  0xa7   :  { %v207_v22 = vadd.f32 %v206_v19, %v157_v16 }
  0xa9   :  { %v210_v23 = vpack.c.bf16 %v207_v22, %v194_v18  ;;  %v1012_v22 = vld [vmem:[%s1369_s4] ss:$0 sm:$0xff] }
  0xab   :  { %v1319_v26 = vunpack.c.l.bf16 %v210_v23  ;;  %v1321_v27 = vunpack.c.h.bf16 %v210_v23 }
  0xad   :  { %v213_v30 = vmul.f32 %v1319_v26, %v1319_v26  ;;  %v214_v31 = vmul.f32 %v1321_v27, %v1321_v27  ;;  %v195_v32 = vpop.f32.mrf.mxu0 }
  0xae   :  { %v208_v33 = vpop.f32.mrf.mxu1 }
  0xaf   :  { %v215_v34 = vpack.c.bf16 %v214_v31, %v213_v30  ;;  %v982_v31 = vld [vmem:[#allocation9 + $0x30] sm:$0xff] }
  0xb0   :  { %512 = vmatpush.bf16.msrb.mxu0 %v982_v31 }
  0xb1   :  { %v216_v37 = vunpack.c.l.bf16 %v215_v34  ;;  %v217_v38 = vunpack.c.h.bf16 %v215_v34 }
  0xb3   :  { %v218_v39 = vmul.f32 %v216_v37, %v1319_v26  ;;  %v219_v40 = vmul.f32 %v217_v38, %v1321_v27 }
  0xb5   :  { %v220_v43 = vpack.c.bf16 %v219_v40, %v218_v39  ;;  %v979_v39 = vld [vmem:[#allocation9 + $0x18] sm:$0xff] }
  0xb7   :  { %v221_v44 = vunpack.c.l.bf16 %v220_v43  ;;  %v222_v45 = vunpack.c.h.bf16 %v220_v43 }
  0xb9   :  { %v223_v48 = vmul.f32 0.044677734, %v221_v44  ;;  %v224_v49 = vmul.f32 0.044677734, %v222_v45  ;;  %v977_v45 = vld [vmem:[#allocation9 + $0x8] sm:$0xff] }
  0xbb   :  { %v225_v50 = vpack.c.bf16 %v224_v49, %v223_v48  ;;  %v976_v48 = vld [vmem:[#allocation9] sm:$0xff] }
  0xbd   :  { %v226_v53 = vunpack.c.l.bf16 %v225_v50  ;;  %v227_v54 = vunpack.c.h.bf16 %v225_v50 }
  0xbf   :  { %v228_v55 = vadd.f32 %v226_v53, %v1319_v26  ;;  %v229_v56 = vadd.f32 %v227_v54, %v1321_v27 }
  0xc1   :  { %v230_v59 = vpack.c.bf16 %v229_v56, %v228_v55 }
  0xc3   :  { %v231_v60 = vunpack.c.l.bf16 %v230_v59  ;;  %v232_v61 = vunpack.c.h.bf16 %v230_v59 }
  0xc5   :  { %v233_v62 = vmul.f32 0.796875, %v231_v60  ;;  %v234_v63 = vmul.f32 0.796875, %v232_v61 }
  0xc7   :  { %v235_v0 = vpack.c.bf16 %v234_v63, %v233_v62 }
  0xc9   :  { %v236_v1 = vunpack.c.l.bf16 %v235_v0  ;;  %v237_v2 = vunpack.c.h.bf16 %v235_v0 }
  0xcb   :  { %1016 = vtanh.f32 %v236_v1  ;;  %v145_v1 = vlaneseq }
  0xcc   :  { %1018 = vtanh.f32 %v237_v2 }
  0xcd   :  { %v1336_v2 = vand.u32 127, %v145_v1 }
  0xcf   :  { %vm147_vm1 = vcmp.lt.s32.totalorder %v1336_v2, 16 }
  0xd1   :  { %v1017_v3 = vpop.eup %1016 }
  0xd2   :  { %v1019_v4 = vpop.eup %1018 }
  0xd3   :  { %v240_v5 = vpack.c.bf16 %v1019_v4, %v1017_v3  ;;  %v1013_v3 = vld [vmem:[%s1371_s6] ss:$0 sm:$0xff] }
  0xd5   :  { %v241_v6 = vunpack.c.l.bf16 %v240_v5  ;;  %v242_v7 = vunpack.c.h.bf16 %v240_v5 }
  0xd7   :  { %v243_v8 = vadd.f32 1.0, %v241_v6  ;;  %v244_v9 = vadd.f32 1.0, %v242_v7 }
  0xd9   :  { %v245_v10 = vpack.c.bf16 %v244_v9, %v243_v8  ;;  %v991_v9 = vld [vmem:[#allocation10 + $0x38] sm:$0xff] }
  0xda   :  { %608 = vmatpush.bf16.msrb.mxu1 %v991_v9 }
  0xdb   :  { %v246_v11 = vunpack.c.l.bf16 %v245_v10  ;;  %v247_v12 = vunpack.c.h.bf16 %v245_v10  ;;  %v990_v10 = vld [vmem:[#allocation10 + $0x30] sm:$0xff] }
  0xdd   :  { %v248_v13 = vmul.f32 0.5, %v246_v11  ;;  %v249_v14 = vmul.f32 0.5, %v247_v12  ;;  %v989_v11 = vld [vmem:[#allocation10 + $0x28] sm:$0xff]  ;;  %v988_v12 = vld [vmem:[#allocation10 + $0x20] sm:$0xff] }
  0xde   :  { %609 = vmatpush.bf16.msrb.mxu1 %v990_v10 }
  0xdf   :  { %v250_v15 = vpack.c.bf16 %v249_v14, %v248_v13  ;;  %v987_v13 = vld [vmem:[#allocation10 + $0x18] sm:$0xff] }
  0xe1   :  { %v251_v16 = vunpack.c.l.bf16 %v250_v15  ;;  %v252_v17 = vunpack.c.h.bf16 %v250_v15 }
  0xe2   :  { %610 = vmatpush.bf16.msrb.mxu1 %v989_v11 }
  0xe3   :  { %v253_v18 = vmul.f32 %v251_v16, %v1319_v26  ;;  %v254_v19 = vmul.f32 %v252_v17, %v1321_v27  ;;  %v981_v26 = vld [vmem:[#allocation9 + $0x28] sm:$0xff] }
  0xe4   :  { %513 = vmatpush.bf16.msrb.mxu0 %v981_v26  ;;  %v998_v26 = vld [vmem:[#allocation12 + $0x30] sm:$0xff] }
  0xe5   :  { %v255_v20 = vpack.c.bf16 %v253_v18, %v253_v18  ;;  %v256_v21 = vpack.c.bf16 %v254_v19, %v254_v19  ;;  %v986_v19 = vld [vmem:[#allocation10 + $0x10] sm:$0xff] }
  0xe6   :  { %611 = vmatpush.bf16.msrb.mxu1 %v988_v12 }
  0xe7   :  { %397 = vmatmul.bf16.vlgmr.msra.gmra.mxu2 %v255_v20  ;;  %410 = vmatmul.bf16.vlgmr.msra.gmra.mxu3 %v256_v21  ;;  %v985_v20 = vld [vmem:[#allocation10 + $0x8] sm:$0xff]  ;;  %v984_v21 = vld [vmem:[#allocation10] sm:$0xff] }
  0xe8   :  { %514 = vmatpush.bf16.msrb.mxu0 %v980_v36 }
  0xea   :  { %612 = vmatpush.bf16.msrb.mxu1 %v987_v13 }
  0xec   :  { %515 = vmatpush.bf16.msrb.mxu0 %v979_v39 }
  0xee   :  { %613 = vmatpush.bf16.msrb.mxu1 %v986_v19 }
  0xf0   :  { %516 = vmatpush.bf16.msrb.mxu0 %v978_v42 }
  0xf2   :  { %614 = vmatpush.bf16.msrb.mxu1 %v985_v20 }
  0xf4   :  { %517 = vmatpush.bf16.msrb.mxu0 %v977_v45 }
  0xf6   :  { %615 = vmatpush.bf16.msrb.mxu1 %v984_v21 }
  0xf8   :  { %518 = vmatpush.bf16.msrb.mxu0 %v976_v48 }
 0x16a   :  { %v398_v23 = vpop.f32.mrf.mxu2  ;;  %v411_v24 = vpop.f32.mrf.mxu3 }
 0x16b   :  { %v399_v25 = vadd.f32 %v1012_v22, %v398_v23 }
 0x16d   :  { %v412_v29 = vadd.f32 %v411_v24, %v399_v25 }
 0x16f   :  { %v415_v30 = vpack.c.bf16 %v412_v29, %v412_v29  ;;  %v999_v29 = vld [vmem:[#allocation12 + $0x38] sm:$0xff] }
 0x170   :  { %717 = vmatpush.bf16.msrb.mxu2 %v999_v29 }
 0x171   :  { %v416_v32 = vunpack.c.l.bf16 %v415_v30 }
 0x172   :  { %v400_v27 = vpop.f32.mrf.mxu2  ;;  %v413_v33 = vpop.f32.mrf.mxu3 }
 0x173   :  { %v417_v34 = vmul.f32 %v416_v32, %v416_v32  ;;  %v997_v33 = vld [vmem:[#allocation12 + $0x28] sm:$0xff] }
 0x174   :  { %718 = vmatpush.bf16.msrb.mxu2 %v998_v26 }
 0x175   :  { %v418_v35 = vpack.c.bf16 %v417_v34, %v417_v34 }
 0x177   :  { %v419_v37 = vunpack.c.l.bf16 %v418_v35 }
 0x178   :  { %719 = vmatpush.bf16.msrb.mxu2 %v997_v33 }
 0x179   :  { %v420_v38 = vmul.f32 %v419_v37, %v416_v32  ;;  %v996_v37 = vld [vmem:[#allocation12 + $0x20] sm:$0xff] }
 0x17b   :  { %v421_v40 = vpack.c.bf16 %v420_v38, %v420_v38 }
 0x17c   :  { %720 = vmatpush.bf16.msrb.mxu2 %v996_v37 }
 0x17d   :  { %v422_v41 = vunpack.c.l.bf16 %v421_v40  ;;  %v995_v40 = vld [vmem:[#allocation12 + $0x18] sm:$0xff] }
 0x17f   :  { %v423_v43 = vmul.f32 0.044677734, %v422_v41 }
 0x180   :  { %721 = vmatpush.bf16.msrb.mxu2 %v995_v40 }
 0x181   :  { %v424_v44 = vpack.c.bf16 %v423_v43, %v423_v43  ;;  %v994_v43 = vld [vmem:[#allocation12 + $0x10] sm:$0xff] }
 0x183   :  { %v425_v46 = vunpack.c.l.bf16 %v424_v44 }
 0x184   :  { %722 = vmatpush.bf16.msrb.mxu2 %v994_v43 }
 0x185   :  { %v426_v47 = vadd.f32 %v425_v46, %v416_v32  ;;  %v993_v46 = vld [vmem:[#allocation12 + $0x8] sm:$0xff] }
 0x187   :  { %v427_v49 = vpack.c.bf16 %v426_v47, %v426_v47 }
 0x188   :  { %723 = vmatpush.bf16.msrb.mxu2 %v993_v46 }
 0x189   :  { %v428_v50 = vunpack.c.l.bf16 %v427_v49  ;;  %v992_v49 = vld [vmem:[#allocation12] sm:$0xff] }
 0x18b   :  { %v429_v51 = vmul.f32 0.796875, %v428_v50 }
 0x18c   :  { %724 = vmatpush.bf16.msrb.mxu2 %v992_v49 }
 0x18d   :  { %v430_v52 = vpack.c.bf16 %v429_v51, %v429_v51 }
 0x18f   :  { %v431_v53 = vunpack.c.l.bf16 %v430_v52 }
 0x191   :  { %1020 = vtanh.f32 %v431_v53 }
 0x197   :  { %v1021_v54 = vpop.eup %1020 }
 0x198   :  { %v433_v55 = vpack.c.bf16 %v1021_v54, %v1021_v54 }
 0x19a   :  { %v434_v56 = vunpack.c.l.bf16 %v433_v55 }
 0x19c   :  { %v435_v57 = vadd.f32 1.0, %v434_v56 }
 0x19e   :  { %v436_v58 = vpack.c.bf16 %v435_v57, %v435_v57 }
 0x1a0   :  { %v437_v59 = vunpack.c.l.bf16 %v436_v58 }
 0x1a2   :  { %v438_v60 = vmul.f32 0.5, %v437_v59 }
 0x1a4   :  { %v439_v61 = vpack.c.bf16 %v438_v60, %v438_v60 }
 0x1a6   :  { %v440_v62 = vunpack.c.l.bf16 %v439_v61 }
 0x1a8   :  { %v441_v63 = vmul.f32 %v440_v62, %v416_v32 }
 0x1aa   :  { %v442_v0 = vpack.c.bf16 %v441_v63, %v441_v63 }
 0x1ac   :  { %519 = vmatmul.bf16.vlgmr.msrb.gmra.mxu0 %v442_v0 }
 0x229   :  { %v520_v4 = vpop.f32.mrf.mxu0 }
 0x22a   :  { %v521_v5 = vadd.f32 %v1013_v3, %v520_v4  ;;  %v1015_v3 = vld [vmem:[%s1375_s10] ss:$0 sm:$0xff] }
 0x22c   :  { %v526_v6 = vsel %vm147_vm1, %v521_v5, -inf }
 0x22d   :  { %v528_v7 = vsel %vm527_vm2, %v526_v6, -inf }
 0x22e   :  { %529 = vmax.xlane.f32.xlu0 %v528_v7 }
 0x231   :  { %v522_v8 = vpop.f32.mrf.mxu0 }
 0x2a1   :  { %v530_v14 = vpop.xlane.xlu0 %529 }
 0x2a2   :  { %v531_v15 = vsub.f32 %v526_v6, %v530_v14 }
 0x2a4   :  { %v532_v16 = vmul.f32 1.442695, %v531_v15 }
 0x2a6   :  { %1022 = vpow2.f32 %v532_v16 }
 0x2ac   :  { %v1023_v17 = vpop.eup %1022 }
 0x2ad   :  { %v534_v18 = vsel %vm527_vm2, %v1023_v17, 0.0 }
 0x2ae   :  { %535 = vadd.xlane.f32.xlu0 %v534_v18  ;;  %v1225_v18 = vmov 1065369472  }
 0x2af   :  { %v739_v19 = vunpack.c.h.bf16 %v1225_v18  ;;  %v740_v20 = vunpack.c.l.bf16 %v1225_v18 }
 0x321   :  { %v536_v22 = vpop.xlane.xlu0 %535 }
 0x322   :  { %1024 = vrcp.f32 %v536_v22 }
 0x328   :  { %v1025_v23 = vpop.eup %1024 }
 0x329   :  { %v1346_v24 = vmul.f32 %v1025_v23, %v1023_v17 }
 0x32b   :  { %v539_v25 = vpack.c.bf16 %v1346_v24, %v1346_v24 }
 0x32d   :  { %616 = vmatmul.bf16.vlgmr.msrb.gmra.mxu1 %v539_v25 }
 0x3aa   :  { %v617_v30 = vpop.f32.mrf.mxu1 }
 0x3ab   :  { %v618_v31 = vadd.f32 %v1014_v28, %v617_v30 }
 0x3ad   :  { %v621_v32 = vpack.c.bf16 %v618_v31, %v618_v31 }
 0x3af   :  { %v622_v27 = vunpack.c.l.bf16 %v621_v32 }
 0x3b1   :  { %v623_v34 = vmul.f32 %v622_v27, %v622_v27 }
 0x3b2   :  { %v619_v35 = vpop.f32.mrf.mxu1 }
 0x3b3   :  { %v624_v36 = vpack.c.bf16 %v623_v34, %v623_v34 }
 0x3b5   :  { %v625_v38 = vunpack.c.l.bf16 %v624_v36 }
 0x3b7   :  { %v626_v39 = vmul.f32 %v625_v38, %v622_v27 }
 0x3b9   :  { %v627_v41 = vpack.c.bf16 %v626_v39, %v626_v39 }
 0x3bb   :  { %v628_v42 = vunpack.c.l.bf16 %v627_v41 }
 0x3bd   :  { %v629_v44 = vmul.f32 0.044677734, %v628_v42 }
 0x3bf   :  { %v630_v45 = vpack.c.bf16 %v629_v44, %v629_v44 }
 0x3c1   :  { %v631_v47 = vunpack.c.l.bf16 %v630_v45 }
 0x3c3   :  { %v632_v48 = vadd.f32 %v631_v47, %v622_v27 }
 0x3c5   :  { %v633_v50 = vpack.c.bf16 %v632_v48, %v632_v48 }
 0x3c7   :  { %v634_v51 = vunpack.c.l.bf16 %v633_v50 }
 0x3c9   :  { %v635_v52 = vmul.f32 0.796875, %v634_v51 }
 0x3cb   :  { %v636_v53 = vpack.c.bf16 %v635_v52, %v635_v52 }
 0x3cd   :  { %v637_v54 = vunpack.c.l.bf16 %v636_v53 }
 0x3cf   :  { %1026 = vtanh.f32 %v637_v54 }
 0x3d5   :  { %v1027_v55 = vpop.eup %1026 }
 0x3d6   :  { %v639_v56 = vpack.c.bf16 %v1027_v55, %v1027_v55 }
 0x3d8   :  { %v640_v57 = vunpack.c.l.bf16 %v639_v56 }
 0x3da   :  { %v641_v58 = vadd.f32 1.0, %v640_v57 }
 0x3dc   :  { %v642_v59 = vpack.c.bf16 %v641_v58, %v641_v58 }
 0x3de   :  { %v643_v60 = vunpack.c.l.bf16 %v642_v59 }
 0x3e0   :  { %v644_v61 = vmul.f32 0.5, %v643_v60 }
 0x3e2   :  { %v645_v62 = vpack.c.bf16 %v644_v61, %v644_v61 }
 0x3e4   :  { %v646_v63 = vunpack.c.l.bf16 %v645_v62 }
 0x3e6   :  { %v647_v0 = vmul.f32 %v646_v63, %v622_v27 }
 0x3e8   :  { %v648_v1 = vpack.c.bf16 %v647_v0, %v647_v0 }
 0x3ea   :  { %725 = vmatmul.bf16.vlgmr.msrb.gmra.mxu2 %v648_v1 }
 0x46d   :  { %v726_v4 = vpop.f32.mrf.mxu2 }
 0x46e   :  { %v727_v5 = vadd.f32 %v1015_v3, %v726_v4 }
 0x470   :  { %v730_v6 = vpack.c.bf16 %v727_v5, %v727_v5 }
 0x472   :  { %v731_v7 = vxor.u32 2147516416, %v730_v6 }
 0x474   :  { %v732_v8 = vunpack.c.l.bf16 %v731_v7 }
 0x475   :  { %v728_v9 = vpop.f32.mrf.mxu2 }
 0x476   :  { %v733_v10 = vmul.f32 1.442695, %v732_v8 }
 0x478   :  { %1028 = vpow2.f32 %v733_v10 }
 0x47e   :  { %v1029_v11 = vpop.eup %1028 }
 0x47f   :  { %v735_v12 = vpack.c.bf16 %v1029_v11, %v1029_v11 }
 0x481   :  { %v736_v13 = vunpack.c.l.bf16 %v735_v12 }
 0x483   :  { %v737_v14 = vadd.f32 1.0, %v736_v13 }
 0x485   :  { %v738_v15 = vpack.c.bf16 %v737_v14, %v737_v14 }
 0x487   :  { %v741_v16 = vunpack.c.h.bf16 %v738_v15  ;;  %v742_v17 = vunpack.c.l.bf16 %v738_v15 }
 0x489   :  { %1030 = vrcp.f32 %v741_v16 }
 0x48a   :  { %1032 = vrcp.f32 %v742_v17 }
 0x48f   :  { %v1031_v21 = vpop.eup %1030 }
 0x490   :  { %v1033_v22 = vpop.eup %1032  ;;  %v744_v23 = vmul.f32 %v1031_v21, %v739_v19 }
 0x491   :  { %v746_v25 = vmul.f32 %v1033_v22, %v740_v20 }
 0x493   :  { %v747_v28 = vpack.c.bf16 %v744_v23, %v746_v25 }
 0x495   :  { %v748_v29 = vunpack.c.l.bf16 %v747_v28 }
 0x497   :  { %v749_v30 = vmul.f32 %v748_v29, %v1346_v24 }
 0x499   :  { %v750_v31 = vsel %vm147_vm1, %v749_v30, -inf }
 0x49a   :  { %v751_v32 = vsel %vm527_vm2, %v750_v31, -inf }
 0x49b   :  { %752 = vmax.xlane.f32.xlu1 %v751_v32 }
 0x50e   :  { %v753_v26 = vpop.xlane.xlu1 %752 }
 0x50f   :  { %v754_v27 = vsub.f32 %v750_v31, %v753_v26 }
 0x511   :  { %v755_v33 = vmul.f32 1.442695, %v754_v27 }
 0x513   :  { %1034 = vpow2.f32 %v755_v33 }
 0x519   :  { %v1035_v34 = vpop.eup %1034 }
 0x51a   :  { %v757_v35 = vsel %vm527_vm2, %v1035_v34, 0.0 }
 0x51b   :  { %758 = vadd.xlane.f32.xlu1 %v757_v35 }
 0x58e   :  { %v759_v36 = vpop.xlane.xlu1 %758 }
 0x58f   :  { %1036 = vrcp.f32 %v759_v36 }
 0x595   :  { %v1037_v37 = vpop.eup %1036 }
 0x596   :  { %v761_v38 = vmul.f32 %v1037_v37, %v1035_v34 }
 0x598   :  { %v762_v24 = vsel %vm527_vm2, %v761_v38, 0.0 }
 0x599   :  { %v763_v39 = vrot.slane %v762_v24, 4 }
 0x59b   :  { %v764_v2 = vadd.f32 %v763_v39, %v762_v24 }
 0x59d   :  { %v765_v40 = vrot.slane %v764_v2, 2 }
 0x59f   :  { %v766_v41 = vadd.f32 %v765_v40, %v764_v2 }
 0x5a1   :  { %v767_v42 = vrot.slane %v766_v41, 1 }
 0x5a3   :  { %v768_v43 = vadd.f32 %v767_v42, %v766_v41 }
 0x5a5   :  { %769 = vst [vmem:[%s1376_s11] sm:$0xff] %v768_v43 }
 0x5a6   :  { %774 = vsyncpa [#allocation3], 1 }
 0x5a7   :  { %775 = vsyncpa [#allocation5], 1 }
 0x5a8   :  { %776 = vsyncpa [#allocation8], 1 }
 0x5a9   :  { %777 = vsyncpa [#allocation11], 1 }

</bundles_post_ra>
